<compile_context>
chip_gen: v5e
topology: v5e:2x2
jax: 0.10.0
libtpu: 0.0.40
codegen_flags: <defaults>
</compile_context>

<pallas_src>
import jax
import jax.numpy as jnp
from jax.experimental import pallas as pl
from jax.experimental.pallas import tpu as pltpu


# Default tile caps (elements).  Largest tile that (a) divides the dim,
# (b) is a multiple of 128 (joint lane/sublane constraint for both the x
# (tn, tm) block and the transposed w (tm, tn) block), and (c) keeps
# double-buffered f32 tiles well inside the scoped-VMEM default on all
# generations (including v7x's 64 MiB physical / 32 MiB scoped).
_TN_MAX = 512
_TM_MAX = 1024
_ALIGN = 128


def _pick_tile(dim, cap, align=_ALIGN):
    """Largest t <= cap with t % align == 0 and dim % t == 0; else full dim."""
    if dim <= cap:
        return dim
    t = (cap // align) * align
    while t >= align:
        if dim % t == 0:
            return t
        t -= align
    return dim  # full extent is always a legal block shape


def _check_tile(name, t, dim):
    if dim % t != 0:
        raise ValueError(f"{name}={t} must divide the corresponding dim {dim}")
    if t != dim and t % _ALIGN != 0:
        raise ValueError(f"{name}={t} must be a multiple of {_ALIGN} or the full dim")


def _sum_and_output_kernel(x_ref, w_ref, row_ref, xsum_ref, row_acc, xsum_acc):
    """Grid = (N-tiles [parallel], M-tiles [arbitrary reduction]).

    x_ref:    (tn, tm) tile of x
    w_ref:    (tm, tn) tile of training_outputs (native (M, N) layout)
    row_ref:  (tn, 1)  per-row sum of x * training_outputs.T   (output)
    xsum_ref: (tn, 1)  per-row sum of x (for the global s0)     (output)
    row_acc / xsum_acc: (tn, 1) f32 VMEM accumulators
    """
    k = pl.program_id(1)

    @pl.when(k == 0)
    def _():
        row_acc[...] = jnp.zeros_like(row_acc)
        xsum_acc[...] = jnp.zeros_like(xsum_acc)

    # Upcast in VMEM (free on the VPU); native dtype is what crossed HBM.
    x = x_ref[...].astype(jnp.float32)            # (tn, tm)
    w = w_ref[...].astype(jnp.float32)            # (tm, tn)
    wt = w.T                                      # (tn, tm) — XLU transpose, idle slot

    row_acc[...] += jnp.sum(x * wt, axis=1, keepdims=True)   # (tn, 1)
    xsum_acc[...] += jnp.sum(x, axis=1, keepdims=True)        # (tn, 1)

    @pl.when(k == pl.num_programs(1) - 1)
    def _():
        row_ref[...] = row_acc[...]
        xsum_ref[...] = xsum_acc[...]


def sum_and_output_layer(x, training_outputs, *, tn=None, tm=None):
    """x: (N, M), training_outputs: (M, N)  ->  (N,) in the promoted input dtype.

    Equivalent to: (x * training_outputs.T).sum(axis=1) / x.sum()
    """
    N, M = x.shape
    if training_outputs.shape != (M, N):
        raise ValueError(
            f"training_outputs must be shape {(M, N)}, got {training_outputs.shape}")

    tn = _pick_tile(N, _TN_MAX) if tn is None else tn
    tm = _pick_tile(M, _TM_MAX) if tm is None else tm
    _check_tile("tn", tn, N)
    _check_tile("tm", tm, M)

    grid = (N // tn, M // tm)

    row, xsum = pl.pallas_call(
        _sum_and_output_kernel,
        out_shape=(
            jax.ShapeDtypeStruct((N, 1), jnp.float32),
            jax.ShapeDtypeStruct((N, 1), jnp.float32),
        ),
        grid_spec=pltpu.PrefetchScalarGridSpec(
            num_scalar_prefetch=0,
            grid=grid,
            in_specs=[
                # x: (N, M) tiled (tn, tm)
                pl.BlockSpec((tn, tm), lambda i, k: (i, k)),
                # training_outputs: (M, N) tiled (tm, tn) with swapped indices
                # (transposed in-kernel; no host-side transpose pass).
                pl.BlockSpec((tm, tn), lambda i, k: (k, i)),
            ],
            out_specs=[
                pl.BlockSpec((tn, 1), lambda i, k: (i, 0)),
                pl.BlockSpec((tn, 1), lambda i, k: (i, 0)),
            ],
            scratch_shapes=[
                pltpu.VMEM((tn, 1), jnp.float32),
                pltpu.VMEM((tn, 1), jnp.float32),
            ],
        ),
        compiler_params=pltpu.CompilerParams(
            dimension_semantics=("parallel", "arbitrary"),
        ),
    )(x, training_outputs)

    # Global s0 and the final divide: trivial (N,)-sized work, done in plain JAX
    # so s0 stays a reduction over ALL of x even with the N axis parallel.
    # NOTE: matches PyTorch — if x.sum() ~ 0 the result is inf/NaN.
    s0 = jnp.sum(xsum)
    out_dtype = jnp.result_type(x.dtype, training_outputs.dtype)
    return (row[:, 0] / s0).astype(out_dtype)


if __name__ == "__main__":
    # Small shapes consistent with the forward: x (N, M), training_outputs (M, N).
    N, M = 256, 512

    key = jax.random.PRNGKey(0)
    kx, kw = jax.random.split(key)
    # Positive-valued x keeps s0 well away from zero.
    x = jax.random.uniform(kx, (N, M), dtype=jnp.float32, minval=0.1, maxval=1.0)
    training_outputs = jax.random.uniform(
        kw, (M, N), dtype=jnp.float32, minval=-1.0, maxval=1.0
    )

    ref = (x * training_outputs.T).sum(axis=1) / x.sum()

    # 1) Explicit small tiles -> multi-tile grid (2, 4): exercises the parallel
    #    N axis and the accumulating reduction over M.
    out = jax.block_until_ready(sum_and_output_layer(x, training_outputs, tn=128, tm=128))
    assert out.shape == (N,)
    assert jnp.allclose(out, ref, atol=1e-5, rtol=1e-5)

    # 2) Default tile selection (single block for these small dims).
    out2 = jax.block_until_ready(sum_and_output_layer(x, training_outputs))
    assert jnp.allclose(out2, ref, atol=1e-5, rtol=1e-5)

    # 3) Native bf16 inputs: DMA'd as bf16 (half the HBM traffic), upcast to
    #    f32 inside the kernel; compare against an f32-accumulated reference.
    xb = x.astype(jnp.bfloat16)
    wb = training_outputs.astype(jnp.bfloat16)
    outb = jax.block_until_ready(sum_and_output_layer(xb, wb, tn=128, tm=128))
    refb = (
        (xb.astype(jnp.float32) * wb.T.astype(jnp.float32)).sum(axis=1)
        / xb.astype(jnp.float32).sum()
    ).astype(jnp.bfloat16)
    assert outb.dtype == jnp.bfloat16
    assert jnp.allclose(
        outb.astype(jnp.float32), refb.astype(jnp.float32), atol=1e-6, rtol=2e-2
    )

    print("KERNEL_OK")
</pallas_src>

<mosaic_0001>
module attributes {stable_mosaic.version = 11 : i64} {
  func.func @_sum_and_output_kernel(%arg0: i32, %arg1: i32, %arg2: memref<128x128xf32, #tpu.memory_space<vmem>>, %arg3: memref<128x128xf32, #tpu.memory_space<vmem>>, %arg4: memref<128x1xf32, #tpu.memory_space<vmem>>, %arg5: memref<128x1xf32, #tpu.memory_space<vmem>>, %arg6: memref<128x1xf32, #tpu.memory_space<vmem>>, %arg7: memref<128x1xf32, #tpu.memory_space<vmem>>) attributes {dimension_semantics = [#tpu.dimension_semantics<parallel>, #tpu.dimension_semantics<arbitrary>], iteration_bounds = array<i64: 2, 4>, scalar_prefetch = 0 : i64, scratch_operands = 2 : i64, tpu.core_type = #tpu.core_type<tc>, window_params = [{transform_indices = @transform_0, window_bounds = array<i64: 128, 128>}, {transform_indices = @transform_1, window_bounds = array<i64: 128, 128>}, {transform_indices = @transform_2, window_bounds = array<i64: 128, 1>}, {transform_indices = @transform_3, window_bounds = array<i64: 128, 1>}]} {
    %c0_i32 = arith.constant 0 : i32
    %0 = arith.cmpi eq, %arg1, %c0_i32 : i32
    %1 = arith.extui %0 : i1 to i32
    %c0_i32_0 = arith.constant 0 : i32
    %2 = arith.cmpi ne, %1, %c0_i32_0 : i32
    scf.if %2 {
      %cst_14 = arith.constant 0.000000e+00 : f32
      %20 = vector.broadcast %cst_14 : f32 to vector<128x1xf32>
      %c0_15 = arith.constant 0 : index
      %c0_16 = arith.constant 0 : index
      %21 = vector.load %arg6[%c0_15, %c0_16] : memref<128x1xf32, #tpu.memory_space<vmem>>, vector<128x1xf32>
      tpu.vector_store %arg6[%c0_15, %c0_16], %20 {strides = array<i32>} : memref<128x1xf32, #tpu.memory_space<vmem>>, vector<128x1xf32>,
      %cst_17 = arith.constant 0.000000e+00 : f32
      %22 = vector.broadcast %cst_17 : f32 to vector<128x1xf32>
      %c0_18 = arith.constant 0 : index
      %c0_19 = arith.constant 0 : index
      %23 = vector.load %arg7[%c0_18, %c0_19] : memref<128x1xf32, #tpu.memory_space<vmem>>, vector<128x1xf32>
      tpu.vector_store %arg7[%c0_18, %c0_19], %22 {strides = array<i32>} : memref<128x1xf32, #tpu.memory_space<vmem>>, vector<128x1xf32>,
    } else {
    }
    %c0 = arith.constant 0 : index
    %c0_1 = arith.constant 0 : index
    %3 = vector.load %arg2[%c0, %c0_1] : memref<128x128xf32, #tpu.memory_space<vmem>>, vector<128x128xf32>
    %c0_2 = arith.constant 0 : index
    %c0_3 = arith.constant 0 : index
    %4 = vector.load %arg3[%c0_2, %c0_3] : memref<128x128xf32, #tpu.memory_space<vmem>>, vector<128x128xf32>
    %5 = tpu.transpose %4, [1, 0] : vector<128x128xf32> -> vector<128x128xf32>
    %c0_4 = arith.constant 0 : index
    %c0_5 = arith.constant 0 : index
    %6 = vector.load %arg6[%c0_4, %c0_5] : memref<128x1xf32, #tpu.memory_space<vmem>>, vector<128x1xf32>
    %7 = arith.mulf %3, %5 : vector<128x128xf32>
    %cst = arith.constant dense<0.000000e+00> : vector<128xf32>
    %8 = vector.multi_reduction <add>, %7, %cst [1] : vector<128x128xf32> to vector<128xf32>
    %9 = vector.shape_cast %8 : vector<128xf32> to vector<128x1xf32>
    %10 = arith.addf %6, %9 : vector<128x1xf32>
    %c0_6 = arith.constant 0 : index
    %c0_7 = arith.constant 0 : index
    %11 = vector.load %arg6[%c0_6, %c0_7] : memref<128x1xf32, #tpu.memory_space<vmem>>, vector<128x1xf32>
    tpu.vector_store %arg6[%c0_6, %c0_7], %10 {strides = array<i32>} : memref<128x1xf32, #tpu.memory_space<vmem>>, vector<128x1xf32>,
    %c0_8 = arith.constant 0 : index
    %c0_9 = arith.constant 0 : index
    %12 = vector.load %arg7[%c0_8, %c0_9] : memref<128x1xf32, #tpu.memory_space<vmem>>, vector<128x1xf32>
    %cst_10 = arith.constant dense<0.000000e+00> : vector<128xf32>
    %13 = vector.multi_reduction <add>, %3, %cst_10 [1] : vector<128x128xf32> to vector<128xf32>
    %14 = vector.shape_cast %13 : vector<128xf32> to vector<128x1xf32>
    %15 = arith.addf %12, %14 : vector<128x1xf32>
    %c0_11 = arith.constant 0 : index
    %c0_12 = arith.constant 0 : index
    %16 = vector.load %arg7[%c0_11, %c0_12] : memref<128x1xf32, #tpu.memory_space<vmem>>, vector<128x1xf32>
    tpu.vector_store %arg7[%c0_11, %c0_12], %15 {strides = array<i32>} : memref<128x1xf32, #tpu.memory_space<vmem>>, vector<128x1xf32>,
    %c3_i32 = arith.constant 3 : i32
    %17 = arith.cmpi eq, %arg1, %c3_i32 : i32
    %18 = arith.extui %17 : i1 to i32
    %c0_i32_13 = arith.constant 0 : i32
    %19 = arith.cmpi ne, %18, %c0_i32_13 : i32
    scf.if %19 {
      %c0_14 = arith.constant 0 : index
      %c0_15 = arith.constant 0 : index
      %20 = vector.load %arg6[%c0_14, %c0_15] : memref<128x1xf32, #tpu.memory_space<vmem>>, vector<128x1xf32>
      %c0_16 = arith.constant 0 : index
      %c0_17 = arith.constant 0 : index
      %21 = vector.load %arg4[%c0_16, %c0_17] : memref<128x1xf32, #tpu.memory_space<vmem>>, vector<128x1xf32>
      tpu.vector_store %arg4[%c0_16, %c0_17], %20 {strides = array<i32>} : memref<128x1xf32, #tpu.memory_space<vmem>>, vector<128x1xf32>,
      %c0_18 = arith.constant 0 : index
      %c0_19 = arith.constant 0 : index
      %22 = vector.load %arg7[%c0_18, %c0_19] : memref<128x1xf32, #tpu.memory_space<vmem>>, vector<128x1xf32>
      %c0_20 = arith.constant 0 : index
      %c0_21 = arith.constant 0 : index
      %23 = vector.load %arg5[%c0_20, %c0_21] : memref<128x1xf32, #tpu.memory_space<vmem>>, vector<128x1xf32>
      tpu.vector_store %arg5[%c0_20, %c0_21], %22 {strides = array<i32>} : memref<128x1xf32, #tpu.memory_space<vmem>>, vector<128x1xf32>,
    } else {
    }
    return
  }
  func.func @transform_0(%arg0: i32, %arg1: i32) -> (i32, i32) {
    %c0_i32 = arith.constant 0 : i32
    return %arg0, %arg1 : i32, i32
  }
  func.func @transform_1(%arg0: i32, %arg1: i32) -> (i32, i32) {
    %c0_i32 = arith.constant 0 : i32
    return %arg1, %arg0 : i32, i32
  }
  func.func @transform_2(%arg0: i32, %arg1: i32) -> (i32, i32) {
    %c0_i32 = arith.constant 0 : i32
    %c0_i32_0 = arith.constant 0 : i32
    return %arg0, %c0_i32 : i32, i32
  }
  func.func @transform_3(%arg0: i32, %arg1: i32) -> (i32, i32) {
    %c0_i32 = arith.constant 0 : i32
    %c0_i32_0 = arith.constant 0 : i32
    return %arg0, %c0_i32 : i32, i32
  }
}

</mosaic_0001>

<bundles_post_ra>
// kernel: tpu_custom_call.1
= control target key start
LH: loop header
LB: loop body
LE: loop exit
PB: predicated region body
PF: predicated region fallthrough
CT: control target
= control target key end

     0   :  { %s1352_s0 = inlined_call_operand.hbm [shape: f32[256,512], index: 0, kind: input, shape index: {}]   ;;  %s1353_s1 = inlined_call_operand.hbm [shape: f32[512,256], index: 1, kind: input, shape index: {}]   ;;  %s1354_s2 = inlined_call_operand.vmem [shape: f32[256,1], index: 2, kind: output, shape index: {0}]   ;;  %s1355_s3 = inlined_call_operand.vmem [shape: f32[256,1], index: 3, kind: output, shape index: {1}]  }
   0x1   :  { %1358 = sst [smem:[#allocation13_spill]] %s1352_s0 }
   0x2   :  { %9 = vsyncpa [#allocation5], 0 }
   0x3   :  { %11 = vsyncpa [#allocation5 + $0x1], 0 }
   0x4   :  { %12 = vsyncpa [#allocation7], 0 }
   0x5   :  { %14 = vsyncpa [#allocation7 + $0x1], 0  ;;  %s1021_s12 = smov 0   ;;  %s1023_s13 = smov 0  }
   0x6   :  { %s1025_s14 = smov 0   ;;  %s1027_s15 = smov 0  }
   0x7   :  { %s1029_s16 = smov 0   ;;  %s1031_s17 = smov 0  }
   0x8   :  { %s1033_s18 = smov 0   ;;  %s1035_s19 = smov 0  }
   0x9 LB: > { %s758_s20 = sadd.s32 4294967295, %s994_s19   ;;  %s29_s21 = sadd.s32 1, %s986_s17  ;;  %s994_s19 = sphi %s1035_s19, %s20_s19   ;;  %s990_s18 = sphi %s1033_s18, %s1375_s18   ;;  %s986_s17 = sphi %s1031_s17, %s1374_s17   ;;  %s982_s16 = sphi %s1029_s16, %s1373_s16   ;;  %s978_s15 = sphi %s1027_s15, %s1372_s15   ;;  %s974_s14 = sphi %s1025_s14, %s1371_s14   ;;  %s970_s13 = sphi %s1023_s13, %s1370_s13   ;;  %s966_s12 = sphi %s1021_s12, %s1369_s12  }
   0xa   : > { %p30_p0 = scmp.ge.s32.totalorder %s29_s21, 4  ;;  %s32_s22 = sadd.s32 1, %s990_s18 }
   0xb   : > { %s41_s23 = sadd.s32 1, %s974_s14  ;;  %p48_p1 = scmp.ne.s32.totalorder %s974_s14, %s970_s13 }
   0xc   : > { %s1377_s21 = smov (%p30_p0, %s29_s21), 0  ;;  %s1379_s22 = smov (!%p30_p0, %s32_s22), %s990_s18 }
   0xd   : > { %1359 = sst [smem:[#allocation10_spill]] %s1377_s21  ;;  %s37_s24 = ssub.s32 %s986_s17, %s1377_s21 }
   0xe   : > { %p49_p2 = scmp.eq.s32.totalorder %s994_s19, 0  ;;  %p34_p3 = scmp.ge.s32.totalorder %s1379_s22, 2 }
   0xf   : > { %p54_p4 = scmp.ne.s32.totalorder %s970_s13, %s966_s12  ;;  %p55_p6 = scmp.eq.s32.totalorder %s758_s20, 0 }
  0x10   : > { %p1072_p5 = por %p49_p2, %p48_p1  ;;  %s1381_s22 = smov (%p34_p3, %s1379_s22), 0 }
  0x11   : > { %1361 = sst [smem:[#allocation11_spill]] %s1381_s22  ;;  %p1078_p7 = por %p55_p6, %p54_p4 }
  0x12   : > { %s36_s27 = ssub.s32 %s990_s18, %s1381_s22  ;;  %p794_p8 = scmp.lt.s32.totalorder %s994_s19, 8 }
  0x13   : > { %s38_s28 = sor.u32 %s37_s24, %s36_s27  ;;  %s1086_s29 = sand.u32 1, %s974_s14  }
  0x14   : > { %p39_p9 = scmp.eq.s32.totalorder %s38_s28, 0  ;;  %s762_s30 = sshll.u32 %s1086_s29, 7 }
  0x15   : > { %s781_s4 = sshll.u32 %s990_s18, 6  ;;  %s162_s8 = scalar_lea.vmem [#allocation4], %s762_s30 }
  0x16   : > { %s1091_s5 = scalar_select %p39_p9, %s974_s14, %s41_s23  }
  0x17   : > { %s167_s6 = sadd.s32 %s986_s17, %s781_s4  ;;  %s172_s9 = sshll.u32 %s162_s8, 4  ;;  %s173_s9 = int_to_ptr.vmem [resolvable:$true] %s172_s9 }
  0x18   : > { %1363 = sst [smem:[#allocation12_spill]] %s1091_s5  ;;  %s765_s7 = sshll.u32 %s167_s6, 3 }
  0x19   : > { %s1364_s0 = sld [smem:[#allocation13_spill]]  ;;  %p1101_p10 = pnand %p794_p8, %p1072_p5 }
  0x1a   : > { %p770_p11 = scmp.ge.s32.totalorder %s994_s19, 1  ;;  %s159_s23 = scalar_lea.sflag [#allocation5], %s1086_s29 }
  0x1b   : > { %s996_s27 = smov 512   ;;  %s997_s28 = smov 128  }
  0x1c   : > { %s998_s4 = smov 8   ;;  %p204_p12 = scmp.lt.s32.totalorder %s994_s19, 9 }
  0x1d   : > { %s782_s6 = sshll.u32 %s986_s17, 5  ;;  %s186_s8 = scalar_lea.vmem [#allocation6], %s762_s30 }
  0x1e   : > { %p205_p13 = pnand %p770_p11, %p204_p12  ;;  %s191_s25 = sadd.s32 %s990_s18, %s782_s6 }
  0x1f   : > { %s169_s12 = scalar_lea.hbm %s1364_s0, %s765_s7  ;;  %s769_s7 = sshll.u32 %s191_s25, 3 }
  0x20   : > { %s170_s20 = sshll.u32 %s169_s12, 4  ;;  %s196_s10 = sshll.u32 %s186_s8, 4  ;;  %s171_s20 = int_to_ptr.hbm [resolvable:$true] %s170_s20  ;;  %s197_s10 = int_to_ptr.vmem [resolvable:$true] %s196_s10 }
  0x21   : > { %790 = dma.hbm_to_vmem [thread:$0]  (!%p1101_p10), %s171_s20, 2048, %s173_s9, %s159_s23, %s996_s27, %s997_s28, %s998_s4  }
  0x22   : > { %s193_s0 = scalar_lea.hbm %s1353_s1, %s769_s7  ;;  %s183_s21 = scalar_lea.sflag [#allocation7], %s1086_s29 }
  0x23   : > { %s194_s22 = sshll.u32 %s193_s0, 4  ;;  %s999_s5 = smov 256   ;;  %s195_s22 = int_to_ptr.hbm [resolvable:$true] %s194_s22 }
  0x24   : > { %793 = dma.hbm_to_vmem [thread:$0]  (!%p1101_p10), %s195_s22, 2048, %s197_s10, %s183_s21, %s999_s5, %s997_s28, %s998_s4  }
  0x25   : > { %208 = sbr.rel (%p205_p13) target bundleno = 533 (0x215), region = 28  ;;  %s210_s9 = sand.u32 (!%p205_p13), 1, %s970_s13  }
  0x26   : > { %s771_s20 = sshll.u32 (!%p205_p13), %s210_s9, 7  ;;  %s211_s23 = scalar_lea.sflag (!%p205_p13), [#allocation5], %s210_s9 }
  0x27   : > { %s1119_s27 = scalar_lea.vmem (!%p205_p13), [#allocation4], %s771_s20 }
  0x2a   : > { %957 = dma.done.wait (%p1078_p7), %s211_s23, 2048  }
  0x2b   : > { %959 = vsyncadd (%p1078_p7), %s211_s23, 4294965248  ;;  %s221_s0 = scalar_lea.sflag [#allocation7], %s210_s9  ;;  %s1125_s30 = scalar_lea.vmem [#allocation6], %s771_s20 }
  0x2c   : > { %961 = dma.done.wait (%p1078_p7), %s221_s0, 2048  }
  0x2d   : > { %963 = vsyncadd (%p1078_p7), %s221_s0, 4294965248  ;;  %s773_s21 = sshll.u32 %s982_s16, 4  ;;  %p777_p1 = scmp.ne.s32.totalorder %s978_s15, 0 }
  0x2e   : > { %p261_p0 = scmp.lt.s32.totalorder %s773_s21, 31 }
  0x2f   : > { %275 = sbr.rel (%p777_p1) target bundleno = 85 (0x55), region = 40 }
  0x30   : > { %s1383_s21 = smov (!%p261_p0, %s773_s21), 31 }
  0x31   : > { %s774_s22 = sshll.u32 %s1383_s21, 3 }
  0x32   : > { %s1135_s24 = scalar_lea.vmem %s1354_s2, %s774_s22  ;;  %s1140_s6 = scalar_lea.vmem %s1355_s3, %s774_s22 }
  0x34   : > { %vm276_vm0 = vcmask 7168   ;;  %v1000_v0 = vmov 0.0  }
  0x35   : > { %277 = vst.msk [vmem:[#allocation2] sm:$0xff] %vm276_vm0, %v1000_v0 }
  0x36   : > { %278 = vst.msk [vmem:[#allocation2 + $0x8] sm:$0xff] %vm276_vm0, %v1000_v0 }
  0x37   : > { %279 = vst.msk [vmem:[#allocation2 + $0x10] sm:$0xff] %vm276_vm0, %v1000_v0 }
  0x38   : > { %280 = vst.msk [vmem:[#allocation2 + $0x18] sm:$0xff] %vm276_vm0, %v1000_v0 }
  0x39   : > { %281 = vst.msk [vmem:[#allocation2 + $0x20] sm:$0xff] %vm276_vm0, %v1000_v0 }
  0x3a   : > { %282 = vst.msk [vmem:[#allocation2 + $0x28] sm:$0xff] %vm276_vm0, %v1000_v0 }
  0x3b   : > { %283 = vst.msk [vmem:[#allocation2 + $0x30] sm:$0xff] %vm276_vm0, %v1000_v0 }
  0x3c   : > { %284 = vst.msk [vmem:[#allocation2 + $0x38] sm:$0xff] %vm276_vm0, %v1000_v0 }
  0x3d   : > { %285 = vst.msk [vmem:[#allocation2 + $0x40] sm:$0xff] %vm276_vm0, %v1000_v0 }
  0x3e   : > { %286 = vst.msk [vmem:[#allocation2 + $0x48] sm:$0xff] %vm276_vm0, %v1000_v0 }
  0x3f   : > { %287 = vst.msk [vmem:[#allocation2 + $0x50] sm:$0xff] %vm276_vm0, %v1000_v0 }
  0x40   : > { %288 = vst.msk [vmem:[#allocation2 + $0x58] sm:$0xff] %vm276_vm0, %v1000_v0 }
  0x41   : > { %289 = vst.msk [vmem:[#allocation2 + $0x60] sm:$0xff] %vm276_vm0, %v1000_v0 }
  0x42   : > { %290 = vst.msk [vmem:[#allocation2 + $0x68] sm:$0xff] %vm276_vm0, %v1000_v0 }
  0x43   : > { %291 = vst.msk [vmem:[#allocation2 + $0x70] sm:$0xff] %vm276_vm0, %v1000_v0 }
  0x44   : > { %292 = vst.msk [vmem:[#allocation2 + $0x78] sm:$0xff] %vm276_vm0, %v1000_v0 }
  0x45   : > { %293 = vst.msk [vmem:[#allocation3] sm:$0xff] %vm276_vm0, %v1000_v0 }
  0x46   : > { %294 = vst.msk [vmem:[#allocation3 + $0x8] sm:$0xff] %vm276_vm0, %v1000_v0 }
  0x47   : > { %295 = vst.msk [vmem:[#allocation3 + $0x10] sm:$0xff] %vm276_vm0, %v1000_v0 }
  0x48   : > { %296 = vst.msk [vmem:[#allocation3 + $0x18] sm:$0xff] %vm276_vm0, %v1000_v0 }
  0x49   : > { %297 = vst.msk [vmem:[#allocation3 + $0x20] sm:$0xff] %vm276_vm0, %v1000_v0 }
  0x4a   : > { %298 = vst.msk [vmem:[#allocation3 + $0x28] sm:$0xff] %vm276_vm0, %v1000_v0 }
  0x4b   : > { %299 = vst.msk [vmem:[#allocation3 + $0x30] sm:$0xff] %vm276_vm0, %v1000_v0 }
  0x4c   : > { %300 = vst.msk [vmem:[#allocation3 + $0x38] sm:$0xff] %vm276_vm0, %v1000_v0 }
  0x4d   : > { %301 = vst.msk [vmem:[#allocation3 + $0x40] sm:$0xff] %vm276_vm0, %v1000_v0 }
  0x4e   : > { %302 = vst.msk [vmem:[#allocation3 + $0x48] sm:$0xff] %vm276_vm0, %v1000_v0 }
  0x4f   : > { %303 = vst.msk [vmem:[#allocation3 + $0x50] sm:$0xff] %vm276_vm0, %v1000_v0 }
  0x50   : > { %304 = vst.msk [vmem:[#allocation3 + $0x58] sm:$0xff] %vm276_vm0, %v1000_v0 }
  0x51   : > { %305 = vst.msk [vmem:[#allocation3 + $0x60] sm:$0xff] %vm276_vm0, %v1000_v0 }
  0x52   : > { %306 = vst.msk [vmem:[#allocation3 + $0x68] sm:$0xff] %vm276_vm0, %v1000_v0 }
  0x53   : > { %307 = vst.msk [vmem:[#allocation3 + $0x70] sm:$0xff] %vm276_vm0, %v1000_v0 }
  0x54   : > { %308 = vst.msk [vmem:[#allocation3 + $0x78] sm:$0xff] %vm276_vm0, %v1000_v0 }
  0x55 PF: > { %v325_v1 = vld [vmem:[%s1125_s30] sm:$0xff]  ;;  %v326_v2 = vld [vmem:[%s1125_s30 + $0x8] sm:$0xff]  ;;  %v327_v3 = vld [vmem:[%s1125_s30 + $0x10] sm:$0xff]  ;;  %vm453_vm1 = vcmask 7168   ;;  %p778_p2 = scmp.ne.s32.totalorder %s978_s15, 3 }
  0x56   : > { %341 = vxpose.xlu0.b32.start [1/16] %v325_v1, 128  ;;  %v328_v4 = vld [vmem:[%s1125_s30 + $0x18] sm:$0xff]  ;;  %v329_v5 = vld [vmem:[%s1125_s30 + $0x20] sm:$0xff]  ;;  %v330_v6 = vld [vmem:[%s1125_s30 + $0x28] sm:$0xff] }
  0x57   : > { %v331_v7 = vld [vmem:[%s1125_s30 + $0x30] sm:$0xff]  ;;  %v332_v8 = vld [vmem:[%s1125_s30 + $0x38] sm:$0xff]  ;;  %v333_v9 = vld [vmem:[%s1125_s30 + $0x40] sm:$0xff] }
  0x58   : > { %v334_v10 = vld [vmem:[%s1125_s30 + $0x48] sm:$0xff]  ;;  %v309_v11 = vld [vmem:[%s1119_s27] sm:$0xff]  ;;  %v335_v12 = vld [vmem:[%s1125_s30 + $0x50] sm:$0xff] }
  0x59   : > { %486 = vadd.xlane.f32.xlu1 %v309_v11  ;;  %v311_v13 = vld [vmem:[%s1119_s27 + $0x10] sm:$0xff]  ;;  %v336_v14 = vld [vmem:[%s1125_s30 + $0x58] sm:$0xff]  ;;  %v310_v15 = vld [vmem:[%s1119_s27 + $0x8] sm:$0xff] }
  0x5a   : > { %v313_v16 = vld [vmem:[%s1119_s27 + $0x20] sm:$0xff]  ;;  %488 = vadd.xlane.f32.xlu2 %v310_v15  ;;  %v312_v18 = vld [vmem:[%s1119_s27 + $0x18] sm:$0xff]  ;;  %v315_v19 = vld [vmem:[%s1119_s27 + $0x30] sm:$0xff] }
  0x5b   : > { %v337_v17 = vld [vmem:[%s1125_s30 + $0x60] sm:$0xff]  ;;  %v338_v20 = vld [vmem:[%s1125_s30 + $0x68] sm:$0xff]  ;;  %v339_v23 = vld [vmem:[%s1125_s30 + $0x70] sm:$0xff] }
  0x5c   : > { %v314_v21 = vld [vmem:[%s1119_s27 + $0x28] sm:$0xff]  ;;  %v1197_v22 = vld [vmem:[%s1119_s27 + $0x40] sm:$0xff]  ;;  %v316_v24 = vld [vmem:[%s1119_s27 + $0x38] sm:$0xff] }
  0x5d   : > { %v1203_v25 = vld [vmem:[%s1119_s27 + $0x50] sm:$0xff]  ;;  %v340_v26 = vld [vmem:[%s1125_s30 + $0x78] sm:$0xff]  ;;  %v1208_v27 = vld [vmem:[%s1119_s27 + $0x48] sm:$0xff] }
  0x5e   : > { %342 = vxpose.xlu0.b32.cont [2/16] %v326_v2, 128  ;;  %v1211_v28 = vld [vmem:[%s1119_s27 + $0x60] sm:$0xff]  ;;  %v1216_v29 = vld [vmem:[%s1119_s27 + $0x58] sm:$0xff]  ;;  %v1220_v30 = vld [vmem:[%s1119_s27 + $0x68] sm:$0xff] }
  0x5f   : > { %v470_v39 = vld [vmem:[#allocation3] sm:$0xff]  ;;  %v472_v44 = vld [vmem:[#allocation3 + $0x10] sm:$0xff]  ;;  %v471_v49 = vld [vmem:[#allocation3 + $0x8] sm:$0xff] }
  0x60   : > { %v474_v51 = vld [vmem:[#allocation3 + $0x20] sm:$0xff]  ;;  %v473_v57 = vld [vmem:[#allocation3 + $0x18] sm:$0xff]  ;;  %v476_v59 = vld [vmem:[#allocation3 + $0x30] sm:$0xff] }
  0x61   : > { %490 = vadd.xlane.f32.xlu1 %v311_v13  ;;  %v475_v1 = vld [vmem:[#allocation3 + $0x28] sm:$0xff] }
  0x62   : > { %492 = vadd.xlane.f32.xlu2 %v312_v18 }
  0x66   : > { %343 = vxpose.xlu0.b32.cont [3/16] %v327_v3, 128  ;;  %v478_v3 = vld [vmem:[#allocation3 + $0x40] sm:$0xff] }
  0x69   : > { %494 = vadd.xlane.f32.xlu1 %v313_v16 }
  0x6a   : > { %496 = vadd.xlane.f32.xlu2 %v314_v21 }
  0x6e   : > { %344 = vxpose.xlu0.b32.cont [4/16] %v328_v4, 128 }
  0x71   : > { %498 = vadd.xlane.f32.xlu1 %v315_v19 }
  0x72   : > { %500 = vadd.xlane.f32.xlu2 %v316_v24 }
  0x76   : > { %345 = vxpose.xlu0.b32.cont [5/16] %v329_v5, 128 }
  0x79   : > { %502 = vadd.xlane.f32.xlu1 %v1197_v22 }
  0x7a   : > { %504 = vadd.xlane.f32.xlu2 %v1208_v27 }
  0x7e   : > { %346 = vxpose.xlu0.b32.cont [6/16] %v330_v6, 128 }
  0x81   : > { %506 = vadd.xlane.f32.xlu1 %v1203_v25 }
  0x82   : > { %508 = vadd.xlane.f32.xlu2 %v1216_v29 }
  0x86   : > { %347 = vxpose.xlu0.b32.cont [7/16] %v331_v7, 128 }
  0x89   : > { %510 = vadd.xlane.f32.xlu1 %v1211_v28 }
  0x8a   : > { %512 = vadd.xlane.f32.xlu2 %v1220_v30 }
  0x8e   : > { %348 = vxpose.xlu0.b32.cont [8/16] %v332_v8, 128 }
  0x96   : > { %349 = vxpose.xlu0.b32.cont [9/16] %v333_v9, 128  ;;  %v477_v9 = vld [vmem:[#allocation3 + $0x38] sm:$0xff] }
  0x9e   : > { %350 = vxpose.xlu0.b32.cont [10/16] %v334_v10, 128 }
  0xa6   : > { %351 = vxpose.xlu0.b32.cont [11/16] %v335_v12, 128 }
  0xae   : > { %352 = vxpose.xlu0.b32.cont [12/16] %v336_v14, 128 }
  0xb6   : > { %353 = vxpose.xlu0.b32.cont [13/16] %v337_v17, 128  ;;  %v479_v17 = vld [vmem:[#allocation3 + $0x48] sm:$0xff] }
  0xbe   : > { %354 = vxpose.xlu0.b32.cont [14/16] %v338_v20, 128 }
  0xc6   : > { %355 = vxpose.xlu0.b32.cont [15/16] %v339_v23, 128 }
  0xcc   : > { %v487_v40 = vpop.xlane.xlu1 %486 }
  0xcd   : > { %v518_v41 = vadd.f32 %v487_v40, %v470_v39  ;;  %v489_v50 = vpop.xlane.xlu2 %488  ;;  %v323_v40 = vld [vmem:[%s1119_s27 + $0x70] sm:$0xff] }
  0xce   : > { %356 = vxpose.xlu0.b32.end [16/16] %v340_v26, 128  ;;  %v519_v53 = vadd.f32 %v489_v50, %v471_v49  ;;  %v481_v26 = vld [vmem:[#allocation3 + $0x58] sm:$0xff] }
  0xcf   : > { %534 = vst.msk [vmem:[#allocation3] sm:$0xff] %vm453_vm1, %v518_v41 }
  0xd0   : > { %535 = vst.msk [vmem:[#allocation3 + $0x8] sm:$0xff] %vm453_vm1, %v519_v53 }
  0xd4   : > { %v491_v45 = vpop.xlane.xlu1 %490 }
  0xd5   : > { %v520_v46 = vadd.f32 %v491_v45, %v472_v44  ;;  %v493_v58 = vpop.xlane.xlu2 %492  ;;  %v324_v44 = vld [vmem:[%s1119_s27 + $0x78] sm:$0xff] }
  0xd6   : > { %v521_v61 = vadd.f32 %v493_v58, %v473_v57  ;;  %v378_v58 = vld [vmem:[#allocation2 + $0x28] sm:$0xff] }
  0xd7   : > { %536 = vst.msk [vmem:[#allocation3 + $0x10] sm:$0xff] %vm453_vm1, %v520_v46 }
  0xd8   : > { %537 = vst.msk [vmem:[#allocation3 + $0x18] sm:$0xff] %vm453_vm1, %v521_v61  ;;  %v379_v61 = vld [vmem:[#allocation2 + $0x30] sm:$0xff] }
  0xdc   : > { %v495_v52 = vpop.xlane.xlu1 %494 }
  0xdd   : > { %v522_v54 = vadd.f32 %v495_v52, %v474_v51  ;;  %v497_v2 = vpop.xlane.xlu2 %496  ;;  %v376_v52 = vld [vmem:[#allocation2 + $0x18] sm:$0xff] }
  0xde   : > { %v523_v5 = vadd.f32 %v497_v2, %v475_v1 }
  0xdf   : > { %538 = vst.msk [vmem:[#allocation3 + $0x20] sm:$0xff] %vm453_vm1, %v522_v54 }
  0xe0   : > { %539 = vst.msk [vmem:[#allocation3 + $0x28] sm:$0xff] %vm453_vm1, %v523_v5 }
  0xe4   : > { %v499_v60 = vpop.xlane.xlu1 %498 }
  0xe5   : > { %v524_v62 = vadd.f32 %v499_v60, %v476_v59  ;;  %v501_v10 = vpop.xlane.xlu2 %500 }
  0xe7   : > { %540 = vst.msk [vmem:[#allocation3 + $0x30] sm:$0xff] %vm453_vm1, %v524_v62 }
  0xec   : > { %v503_v4 = vpop.xlane.xlu1 %502 }
  0xed   : > { %v526_v6 = vadd.f32 %v503_v4, %v478_v3  ;;  %v381_v3 = vld [vmem:[#allocation2 + $0x40] sm:$0xff] }
  0xef   : > { %542 = vst.msk [vmem:[#allocation3 + $0x40] sm:$0xff] %vm453_vm1, %v526_v6  ;;  %v382_v6 = vld [vmem:[#allocation2 + $0x48] sm:$0xff] }
  0xf4   : > { %v507_v12 = vpop.xlane.xlu1 %506 }
  0xfa   : > { %v357_v31 = vpop.trf.xlu0 }
  0xfb   : > { %v389_v32 = vmul.f32 %v357_v31, %v309_v11  ;;  %v480_v11 = vld [vmem:[#allocation3 + $0x50] sm:$0xff] }
  0xfc   : > { %v528_v14 = vadd.f32 %v507_v12, %v480_v11  ;;  %v511_v20 = vpop.xlane.xlu1 %510  ;;  %v384_v12 = vld [vmem:[#allocation2 + $0x58] sm:$0xff] }
  0xfd   : > { %405 = vadd.xlane.f32.xlu1 %v389_v32 }
  0xfe   : > { %544 = vst.msk [vmem:[#allocation3 + $0x50] sm:$0xff] %vm453_vm1, %v528_v14 }
 0x102   : > { %v358_v33 = vpop.trf.xlu0 }
 0x103   : > { %v390_v34 = vmul.f32 %v358_v33, %v310_v15 }
 0x105   : > { %407 = vadd.xlane.f32.xlu1 %v390_v34  ;;  %v483_v34 = vld [vmem:[#allocation3 + $0x68] sm:$0xff] }
 0x10a   : > { %v359_v35 = vpop.trf.xlu0 }
 0x10b   : > { %v391_v36 = vmul.f32 %v359_v35, %v311_v13  ;;  %v525_v13 = vadd.f32 %v501_v10, %v477_v9  ;;  %v383_v9 = vld [vmem:[#allocation2 + $0x50] sm:$0xff] }
 0x10d   : > { %409 = vadd.xlane.f32.xlu2 %v391_v36  ;;  %541 = vst.msk [vmem:[#allocation3 + $0x38] sm:$0xff] %vm453_vm1, %v525_v13 }
 0x112   : > { %v360_v37 = vpop.trf.xlu0 }
 0x113   : > { %v392_v38 = vmul.f32 %v360_v37, %v312_v18  ;;  %v505_v18 = vpop.xlane.xlu2 %504 }
 0x115   : > { %411 = vadd.xlane.f32.xlu2 %v392_v38 }
 0x11a   : > { %v361_v42 = vpop.trf.xlu0 }
 0x11b   : > { %v393_v43 = vmul.f32 %v361_v42, %v313_v16  ;;  %v509_v31 = vpop.xlane.xlu2 %508 }
 0x11c   : > { %v529_v32 = vadd.f32 %v509_v31, %v481_v26  ;;  %v484_v26 = vld [vmem:[#allocation3 + $0x70] sm:$0xff] }
 0x11d   : > { %413 = vadd.xlane.f32.xlu1 %v393_v43 }
 0x11e   : > { %545 = vst.msk [vmem:[#allocation3 + $0x58] sm:$0xff] %vm453_vm1, %v529_v32 }
 0x122   : > { %v362_v47 = vpop.trf.xlu0 }
 0x123   : > { %v394_v48 = vmul.f32 %v362_v47, %v314_v21  ;;  %v527_v21 = vadd.f32 %v505_v18, %v479_v17  ;;  %v513_v35 = vpop.xlane.xlu2 %512  ;;  %v386_v18 = vld [vmem:[#allocation2 + $0x68] sm:$0xff] }
 0x124   : > { %v531_v36 = vadd.f32 %v513_v35, %v483_v34  ;;  %v485_v34 = vld [vmem:[#allocation3 + $0x78] sm:$0xff] }
 0x125   : > { %415 = vadd.xlane.f32.xlu2 %v394_v48  ;;  %543 = vst.msk [vmem:[#allocation3 + $0x48] sm:$0xff] %vm453_vm1, %v527_v21  ;;  %v387_v21 = vld [vmem:[#allocation2 + $0x70] sm:$0xff] }
 0x126   : > { %547 = vst.msk [vmem:[#allocation3 + $0x68] sm:$0xff] %vm453_vm1, %v531_v36 }
 0x12a   : > { %v363_v55 = vpop.trf.xlu0 }
 0x12b   : > { %v395_v56 = vmul.f32 %v363_v55, %v315_v19  ;;  %v482_v19 = vld [vmem:[#allocation3 + $0x60] sm:$0xff] }
 0x12c   : > { %v377_v55 = vld [vmem:[#allocation2 + $0x20] sm:$0xff] }
 0x12d   : > { %417 = vadd.xlane.f32.xlu1 %v395_v56 }
 0x132   : > { %v364_v63 = vpop.trf.xlu0 }
 0x133   : > { %v396_v0 = vmul.f32 %v364_v63, %v316_v24 }
 0x135   : > { %419 = vadd.xlane.f32.xlu2 %v396_v0  ;;  %v380_v0 = vld [vmem:[#allocation2 + $0x38] sm:$0xff] }
 0x13a   : > { %v365_v7 = vpop.trf.xlu0 }
 0x13b   : > { %v397_v8 = vmul.f32 %v365_v7, %v1197_v22  ;;  %v530_v22 = vadd.f32 %v511_v20, %v482_v19 }
 0x13d   : > { %421 = vadd.xlane.f32.xlu1 %v397_v8  ;;  %546 = vst.msk [vmem:[#allocation3 + $0x60] sm:$0xff] %vm453_vm1, %v530_v22 }
 0x142   : > { %v366_v15 = vpop.trf.xlu0 }
 0x143   : > { %v398_v16 = vmul.f32 %v366_v15, %v1208_v27  ;;  %v385_v15 = vld [vmem:[#allocation2 + $0x60] sm:$0xff] }
 0x145   : > { %423 = vadd.xlane.f32.xlu2 %v398_v16 }
 0x14a   : > { %v367_v23 = vpop.trf.xlu0 }
 0x14b   : > { %v399_v24 = vmul.f32 %v367_v23, %v1203_v25 }
 0x14d   : > { %425 = vadd.xlane.f32.xlu1 %v399_v24  ;;  %v388_v24 = vld [vmem:[#allocation2 + $0x78] sm:$0xff] }
 0x152   : > { %v368_v27 = vpop.trf.xlu0 }
 0x153   : > { %v400_v33 = vmul.f32 %v368_v27, %v1216_v29  ;;  %v373_v29 = vld [vmem:[#allocation2] sm:$0xff] }
 0x155   : > { %427 = vadd.xlane.f32.xlu2 %v400_v33 }
 0x15a   : > { %v369_v37 = vpop.trf.xlu0 }
 0x15b   : > { %v401_v25 = vmul.f32 %v369_v37, %v1211_v28  ;;  %v374_v28 = vld [vmem:[#allocation2 + $0x8] sm:$0xff] }
 0x15d   : > { %429 = vadd.xlane.f32.xlu1 %v401_v25 }
 0x162   : > { %v370_v38 = vpop.trf.xlu0 }
 0x163   : > { %v402_v39 = vmul.f32 %v370_v38, %v1220_v30  ;;  %v375_v30 = vld [vmem:[#allocation2 + $0x10] sm:$0xff] }
 0x165   : > { %431 = vadd.xlane.f32.xlu2 %v402_v39 }
 0x16a   : > { %v371_v41 = vpop.trf.xlu0 }
 0x16b   : > { %v403_v42 = vmul.f32 %v371_v41, %v323_v40 }
 0x16d   : > { %433 = vadd.xlane.f32.xlu1 %v403_v42 }
 0x170   : > { %v406_v43 = vpop.xlane.xlu1 %405 }
 0x171   : > { %v437_v45 = vadd.f32 %v406_v43, %v373_v29 }
 0x172   : > { %v372_v46 = vpop.trf.xlu0 }
 0x173   : > { %454 = vst.msk [vmem:[#allocation2] sm:$0xff] %vm453_vm1, %v437_v45  ;;  %v404_v47 = vmul.f32 %v372_v46, %v324_v44 }
 0x175   : > { %435 = vadd.xlane.f32.xlu2 %v404_v47  ;;  %514 = vadd.xlane.f32.xlu1 %v323_v40 }
 0x178   : > { %v408_v48 = vpop.xlane.xlu1 %407 }
 0x179   : > { %v438_v49 = vadd.f32 %v408_v48, %v374_v28 }
 0x17b   : > { %455 = vst.msk [vmem:[#allocation2 + $0x8] sm:$0xff] %vm453_vm1, %v438_v49 }
 0x17d   : > { %516 = vadd.xlane.f32.xlu2 %v324_v44 }
 0x180   : > { %v410_v50 = vpop.xlane.xlu2 %409 }
 0x181   : > { %v439_v51 = vadd.f32 %v410_v50, %v375_v30 }
 0x183   : > { %456 = vst.msk [vmem:[#allocation2 + $0x10] sm:$0xff] %vm453_vm1, %v439_v51 }
 0x188   : > { %v412_v53 = vpop.xlane.xlu2 %411 }
 0x189   : > { %v440_v54 = vadd.f32 %v412_v53, %v376_v52 }
 0x18b   : > { %457 = vst.msk [vmem:[#allocation2 + $0x18] sm:$0xff] %vm453_vm1, %v440_v54 }
 0x190   : > { %v414_v56 = vpop.xlane.xlu1 %413 }
 0x191   : > { %v441_v57 = vadd.f32 %v414_v56, %v377_v55 }
 0x193   : > { %458 = vst.msk [vmem:[#allocation2 + $0x20] sm:$0xff] %vm453_vm1, %v441_v57 }
 0x198   : > { %v416_v59 = vpop.xlane.xlu2 %415 }
 0x199   : > { %v442_v60 = vadd.f32 %v416_v59, %v378_v58 }
 0x19b   : > { %459 = vst.msk [vmem:[#allocation2 + $0x28] sm:$0xff] %vm453_vm1, %v442_v60 }
 0x1a0   : > { %v418_v62 = vpop.xlane.xlu1 %417 }
 0x1a1   : > { %v443_v63 = vadd.f32 %v418_v62, %v379_v61 }
 0x1a3   : > { %460 = vst.msk [vmem:[#allocation2 + $0x30] sm:$0xff] %vm453_vm1, %v443_v63 }
 0x1a8   : > { %v420_v1 = vpop.xlane.xlu2 %419 }
 0x1a9   : > { %v444_v2 = vadd.f32 %v420_v1, %v380_v0 }
 0x1ab   : > { %461 = vst.msk [vmem:[#allocation2 + $0x38] sm:$0xff] %vm453_vm1, %v444_v2 }
 0x1b0   : > { %v422_v4 = vpop.xlane.xlu1 %421 }
 0x1b1   : > { %v445_v5 = vadd.f32 %v422_v4, %v381_v3 }
 0x1b3   : > { %462 = vst.msk [vmem:[#allocation2 + $0x40] sm:$0xff] %vm453_vm1, %v445_v5 }
 0x1b8   : > { %v424_v7 = vpop.xlane.xlu2 %423 }
 0x1b9   : > { %v446_v8 = vadd.f32 %v424_v7, %v382_v6 }
 0x1bb   : > { %463 = vst.msk [vmem:[#allocation2 + $0x48] sm:$0xff] %vm453_vm1, %v446_v8 }
 0x1c0   : > { %v426_v10 = vpop.xlane.xlu1 %425 }
 0x1c1   : > { %v447_v11 = vadd.f32 %v426_v10, %v383_v9 }
 0x1c3   : > { %464 = vst.msk [vmem:[#allocation2 + $0x50] sm:$0xff] %vm453_vm1, %v447_v11 }
 0x1c8   : > { %v428_v13 = vpop.xlane.xlu2 %427 }
 0x1c9   : > { %v448_v14 = vadd.f32 %v428_v13, %v384_v12 }
 0x1cb   : > { %465 = vst.msk [vmem:[#allocation2 + $0x58] sm:$0xff] %vm453_vm1, %v448_v14 }
 0x1d0   : > { %v430_v16 = vpop.xlane.xlu1 %429 }
 0x1d1   : > { %v449_v17 = vadd.f32 %v430_v16, %v385_v15 }
 0x1d3   : > { %466 = vst.msk [vmem:[#allocation2 + $0x60] sm:$0xff] %vm453_vm1, %v449_v17 }
 0x1d8   : > { %v432_v19 = vpop.xlane.xlu2 %431 }
 0x1d9   : > { %v450_v20 = vadd.f32 %v432_v19, %v386_v18 }
 0x1db   : > { %467 = vst.msk [vmem:[#allocation2 + $0x68] sm:$0xff] %vm453_vm1, %v450_v20 }
 0x1e0   : > { %v434_v22 = vpop.xlane.xlu1 %433 }
 0x1e1   : > { %v451_v23 = vadd.f32 %v434_v22, %v387_v21 }
 0x1e3   : > { %468 = vst.msk [vmem:[#allocation2 + $0x70] sm:$0xff] %vm453_vm1, %v451_v23 }
 0x1e8   : > { %v436_v31 = vpop.xlane.xlu2 %435  ;;  %v515_v32 = vpop.xlane.xlu1 %514 }
 0x1e9   : > { %v452_v27 = vadd.f32 %v436_v31, %v388_v24  ;;  %v532_v33 = vadd.f32 %v515_v32, %v484_v26 }
 0x1eb   : > { %469 = vst.msk [vmem:[#allocation2 + $0x78] sm:$0xff] %vm453_vm1, %v452_v27 }
 0x1ec   : > { %548 = vst.msk [vmem:[#allocation3 + $0x70] sm:$0xff] %vm453_vm1, %v532_v33 }
 0x1ef   : > { %553 = sbr.rel (%p778_p2) target bundleno = 533 (0x215), region = 44 }
 0x1f0   : > { %v517_v35 = vpop.xlane.xlu2 %516 }
 0x1f1   : > { %v533_v36 = vadd.f32 %v517_v35, %v485_v34 }
 0x1f3   : > { %549 = vst.msk [vmem:[#allocation3 + $0x78] sm:$0xff] %vm453_vm1, %v533_v36 }
 0x1f4   : > { %v554_v37 = vld [vmem:[#allocation2] sm:$0xff]  ;;  %v555_v25 = vld [vmem:[#allocation2 + $0x8] sm:$0xff]  ;;  %v556_v38 = vld [vmem:[#allocation2 + $0x10] sm:$0xff] }
 0x1f5   : > { %570 = vst.msk [vmem:[%s1135_s24] sm:$0xff] %vm453_vm1, %v554_v37  ;;  %v557_v39 = vld [vmem:[#allocation2 + $0x18] sm:$0xff]  ;;  %v558_v40 = vld [vmem:[#allocation2 + $0x20] sm:$0xff]  ;;  %v559_v41 = vld [vmem:[#allocation2 + $0x28] sm:$0xff] }
 0x1f6   : > { %571 = vst.msk [vmem:[%s1135_s24 + $0x8] sm:$0xff] %vm453_vm1, %v555_v25  ;;  %v560_v42 = vld [vmem:[#allocation2 + $0x30] sm:$0xff]  ;;  %v561_v29 = vld [vmem:[#allocation2 + $0x38] sm:$0xff]  ;;  %v562_v43 = vld [vmem:[#allocation2 + $0x40] sm:$0xff] }
 0x1f7   : > { %572 = vst.msk [vmem:[%s1135_s24 + $0x10] sm:$0xff] %vm453_vm1, %v556_v38  ;;  %v563_v44 = vld [vmem:[#allocation2 + $0x48] sm:$0xff]  ;;  %v564_v45 = vld [vmem:[#allocation2 + $0x50] sm:$0xff]  ;;  %v565_v46 = vld [vmem:[#allocation2 + $0x58] sm:$0xff] }
 0x1f8   : > { %573 = vst.msk [vmem:[%s1135_s24 + $0x18] sm:$0xff] %vm453_vm1, %v557_v39  ;;  %v566_v47 = vld [vmem:[#allocation2 + $0x60] sm:$0xff]  ;;  %v567_v28 = vld [vmem:[#allocation2 + $0x68] sm:$0xff]  ;;  %v568_v48 = vld [vmem:[#allocation2 + $0x70] sm:$0xff] }
 0x1f9   : > { %574 = vst.msk [vmem:[%s1135_s24 + $0x20] sm:$0xff] %vm453_vm1, %v558_v40  ;;  %v569_v49 = vld [vmem:[#allocation2 + $0x78] sm:$0xff]  ;;  %v586_v30 = vld [vmem:[#allocation3] sm:$0xff]  ;;  %v587_v50 = vld [vmem:[#allocation3 + $0x8] sm:$0xff] }
 0x1fa   : > { %575 = vst.msk [vmem:[%s1135_s24 + $0x28] sm:$0xff] %vm453_vm1, %v559_v41  ;;  %v588_v51 = vld [vmem:[#allocation3 + $0x10] sm:$0xff]  ;;  %v589_v52 = vld [vmem:[#allocation3 + $0x18] sm:$0xff]  ;;  %v590_v53 = vld [vmem:[#allocation3 + $0x20] sm:$0xff] }
 0x1fb   : > { %576 = vst.msk [vmem:[%s1135_s24 + $0x30] sm:$0xff] %vm453_vm1, %v560_v42  ;;  %v591_v54 = vld [vmem:[#allocation3 + $0x28] sm:$0xff]  ;;  %v592_v55 = vld [vmem:[#allocation3 + $0x30] sm:$0xff]  ;;  %v593_v56 = vld [vmem:[#allocation3 + $0x38] sm:$0xff] }
 0x1fc   : > { %577 = vst.msk [vmem:[%s1135_s24 + $0x38] sm:$0xff] %vm453_vm1, %v561_v29  ;;  %v594_v57 = vld [vmem:[#allocation3 + $0x40] sm:$0xff]  ;;  %v595_v58 = vld [vmem:[#allocation3 + $0x48] sm:$0xff]  ;;  %v596_v59 = vld [vmem:[#allocation3 + $0x50] sm:$0xff] }
 0x1fd   : > { %578 = vst.msk [vmem:[%s1135_s24 + $0x40] sm:$0xff] %vm453_vm1, %v562_v43  ;;  %v597_v60 = vld [vmem:[#allocation3 + $0x58] sm:$0xff]  ;;  %v598_v61 = vld [vmem:[#allocation3 + $0x60] sm:$0xff]  ;;  %v599_v62 = vld [vmem:[#allocation3 + $0x68] sm:$0xff] }
 0x1fe   : > { %579 = vst.msk [vmem:[%s1135_s24 + $0x48] sm:$0xff] %vm453_vm1, %v563_v44  ;;  %v600_v63 = vld [vmem:[#allocation3 + $0x70] sm:$0xff]  ;;  %v601_v0 = vld [vmem:[#allocation3 + $0x78] sm:$0xff] }
 0x1ff   : > { %580 = vst.msk [vmem:[%s1135_s24 + $0x50] sm:$0xff] %vm453_vm1, %v564_v45 }
 0x200   : > { %581 = vst.msk [vmem:[%s1135_s24 + $0x58] sm:$0xff] %vm453_vm1, %v565_v46 }
 0x201   : > { %582 = vst.msk [vmem:[%s1135_s24 + $0x60] sm:$0xff] %vm453_vm1, %v566_v47 }
 0x202   : > { %583 = vst.msk [vmem:[%s1135_s24 + $0x68] sm:$0xff] %vm453_vm1, %v567_v28 }
 0x203   : > { %584 = vst.msk [vmem:[%s1135_s24 + $0x70] sm:$0xff] %vm453_vm1, %v568_v48 }
 0x204   : > { %585 = vst.msk [vmem:[%s1135_s24 + $0x78] sm:$0xff] %vm453_vm1, %v569_v49 }
 0x205   : > { %602 = vst.msk [vmem:[%s1140_s6] sm:$0xff] %vm453_vm1, %v586_v30 }
 0x206   : > { %603 = vst.msk [vmem:[%s1140_s6 + $0x8] sm:$0xff] %vm453_vm1, %v587_v50 }
 0x207   : > { %604 = vst.msk [vmem:[%s1140_s6 + $0x10] sm:$0xff] %vm453_vm1, %v588_v51 }
 0x208   : > { %605 = vst.msk [vmem:[%s1140_s6 + $0x18] sm:$0xff] %vm453_vm1, %v589_v52 }
 0x209   : > { %606 = vst.msk [vmem:[%s1140_s6 + $0x20] sm:$0xff] %vm453_vm1, %v590_v53 }
 0x20a   : > { %607 = vst.msk [vmem:[%s1140_s6 + $0x28] sm:$0xff] %vm453_vm1, %v591_v54 }
 0x20b   : > { %608 = vst.msk [vmem:[%s1140_s6 + $0x30] sm:$0xff] %vm453_vm1, %v592_v55 }
 0x20c   : > { %609 = vst.msk [vmem:[%s1140_s6 + $0x38] sm:$0xff] %vm453_vm1, %v593_v56 }
 0x20d   : > { %610 = vst.msk [vmem:[%s1140_s6 + $0x40] sm:$0xff] %vm453_vm1, %v594_v57 }
 0x20e   : > { %611 = vst.msk [vmem:[%s1140_s6 + $0x48] sm:$0xff] %vm453_vm1, %v595_v58 }
 0x20f   : > { %612 = vst.msk [vmem:[%s1140_s6 + $0x50] sm:$0xff] %vm453_vm1, %v596_v59 }
 0x210   : > { %613 = vst.msk [vmem:[%s1140_s6 + $0x58] sm:$0xff] %vm453_vm1, %v597_v60 }
 0x211   : > { %614 = vst.msk [vmem:[%s1140_s6 + $0x60] sm:$0xff] %vm453_vm1, %v598_v61 }
 0x212   : > { %615 = vst.msk [vmem:[%s1140_s6 + $0x68] sm:$0xff] %vm453_vm1, %v599_v62 }
 0x213   : > { %616 = vst.msk [vmem:[%s1140_s6 + $0x70] sm:$0xff] %vm453_vm1, %v600_v63 }
 0x214   : > { %617 = vst.msk [vmem:[%s1140_s6 + $0x78] sm:$0xff] %vm453_vm1, %v601_v0 }
 0x215 PF: > { %s20_s19 = sadd.s32 1, %s994_s19   ;;  %s1366_s15 = sld [smem:[#allocation12_spill]] }
 0x216   : > { %p17_p3 = scmp.ge.s32.totalorder %s20_s19, 10   ;;  %s1367_s26 = sld [smem:[#allocation10_spill]] }
 0x217   : > { %s1368_s25 = sld [smem:[#allocation11_spill]]  ;;  %s1369_s12 = smov %s970_s13 }
 0x218   : > { %s1370_s13 = smov %s974_s14  ;;  %s1373_s16 = smov %s990_s18 }
 0x219   :  { %19 = sbr.rel (!%p17_p3) target bundleno = 9 (0x9), region = 101 }
 0x21b   : > { %s1371_s14 = smov %s1366_s15  ;;  %s1372_s15 = smov %s986_s17 }
 0x21c   : > { %s1374_s17 = smov %s1367_s26 }
 0x21d   : > { %s1375_s18 = smov %s1368_s25 }
 0x21e   :  { %657 = vsyncpa [#allocation5], 1 }
 0x21f   :  { %659 = vsyncpa [#allocation5 + $0x1], 1 }
 0x220   :  { %660 = vsyncpa [#allocation7], 1 }
 0x221   :  { %662 = vsyncpa [#allocation7 + $0x1], 1 }

</bundles_post_ra>
